<compile_context>
chip_gen: v6e
topology: v6e:2x2x1
jax: 0.10.0
libtpu: 0.0.40
codegen_flags: <defaults>
</compile_context>

<pallas_src>
import numpy as np

import jax
import jax.numpy as jnp
from jax.experimental import pallas as pl
from jax.experimental.pallas import tpu as pltpu


# ----------------------------------------------------------------------------
# Host-side (once, at __init__): unfold a torch ConvTranspose2d into a GEMM.
# ----------------------------------------------------------------------------
def _convT_as_gemm(w, b, stride, padding, h_in, w_in, h_out, w_out):
    """Unfold ConvTranspose2d (torch weight layout (Cin,Cout,K,K)) into
    y_flat = x_flat @ M + b_full, where x_flat / y_flat are per-sample
    NCHW-flattened vectors.  Includes torch's output_padding semantics implied
    by the requested output size."""
    cin, cout, kh_sz, kw_sz = w.shape
    op = h_out - ((h_in - 1) * stride - 2 * padding + kh_sz)
    assert 0 <= op < stride, "requested output size unreachable"

    M = np.zeros((cin * h_in * w_in, cout * h_out * w_out), np.float64)
    for ci in range(cin):
        for i in range(h_in):
            for j in range(w_in):
                r = (ci * h_in + i) * w_in + j
                for kh in range(kh_sz):
                    oh = i * stride - padding + kh
                    if oh < 0 or oh >= h_out:
                        continue
                    for kw in range(kw_sz):
                        ow = j * stride - padding + kw
                        if ow < 0 or ow >= w_out:
                            continue
                        base = oh * w_out + ow
                        for co in range(cout):
                            M[r, co * h_out * w_out + base] += w[ci, co, kh, kw]
    b_full = np.repeat(b.astype(np.float64), h_out * w_out)[None, :]  # (1, Dout)
    return M, b_full


def _round_up(x, m):
    return ((x + m - 1) // m) * m


# ----------------------------------------------------------------------------
# Pallas kernel: whole decoder = one GEMM + bias + fused tanh.
# ----------------------------------------------------------------------------
def _decoder_kernel(x_ref, m_ref, b_ref, o_ref):
    h = x_ref[...].astype(jnp.bfloat16)                                 # (bt, K) bf16
    acc = jnp.dot(h, m_ref[...], preferred_element_type=jnp.float32)    # MXU, f32 acc
    acc = acc + b_ref[...]                                              # (1, N) broadcast bias
    o_ref[...] = jnp.tanh(acc).astype(o_ref.dtype)                      # fused Tanh (EUP)


# ----------------------------------------------------------------------------
# CNN_Decoder equivalent
# ----------------------------------------------------------------------------
class CNNDecoderPallas:
    def __init__(self, height, kernel, channels, stride, padding, key):
        self.height = height
        self.kernel = kernel
        self.channels = channels
        self.stride = stride
        self.padding = padding
        self.reversed_heights = self._get_reversed_state_shape()
        self.conv_order = list(reversed(range(len(kernel))))  # torch ModuleList order

        # Deterministic parameter init (shapes as nn.ConvTranspose2d).  The
        # per-layer GEMM unfolds are computed once and immediately collapsed
        # into a single (Din, Dout) affine map (no inter-layer nonlinearity).
        self.params = []     # torch-layout (w, b) — used by the reference path
        M_total = None       # np.float64 accumulation for the collapse
        b_total = None
        h_in = self.bottleneck_height()
        for i, conv in enumerate(self.conv_order):
            cin, cout = channels[conv + 1], channels[conv]
            k = kernel[conv]
            s = stride[conv]
            p = padding[conv]
            out_h = self.reversed_heights[i]

            key, wk, bk = jax.random.split(key, 3)
            bound = 1.0 / float(cin * k * k) ** 0.5
            w = jax.random.uniform(wk, (cin, cout, k, k), jnp.float32, -bound, bound)
            b = jax.random.uniform(bk, (cout,), jnp.float32, -bound, bound)
            self.params.append((w, b))

            M, bf = _convT_as_gemm(np.asarray(w), np.asarray(b), s, p,
                                   h_in, h_in, out_h, out_h)
            if M_total is None:
                M_total, b_total = M, bf
            else:
                b_total = b_total @ M + bf
                M_total = M_total @ M
            h_in = out_h

        self.d_in = int(M_total.shape[0])
        self.d_out = int(M_total.shape[1])
        # bf16 weights (MXU fast path, half the weight DMA); f32 bias.
        self.M_total = jnp.asarray(M_total, jnp.bfloat16)
        self.b_total = jnp.asarray(b_total, jnp.float32)

        self._fused_cache = {}

    # -- shape bookkeeping (identical to the torch module) --------------------
    def _get_reversed_state_shape(self):
        heights = [self.height]
        h = self.height
        for conv in range(len(self.kernel)):
            h = int((h + 2 * self.padding[conv] - self.kernel[conv]) / self.stride[conv] + 1)
            heights.append(h)
        return list(reversed(heights))[1:]

    def bottleneck_height(self):
        h = self.height
        for conv in range(len(self.kernel)):
            h = int((h + 2 * self.padding[conv] - self.kernel[conv]) / self.stride[conv] + 1)
        return h

    # -- batch tile: big enough to feed the MXU, >=2 grid steps for large n ----
    @staticmethod
    def _pick_batch_tile(n):
        if n <= 128:
            return n                       # single step; block == full dim is legal
        # >= 2 steps (v7x megacore via dimension_semantics), tiles of <=256 rows.
        return min(256, _round_up(pl.cdiv(n, 2), 8))

    # -- fused pallas_call builder --------------------------------------------
    def _build_fused(self, n, dtype):
        din, dout = self.d_in, self.d_out
        bt = self._pick_batch_tile(n)
        grid = (pl.cdiv(n, bt),)

        w_bytes = self.M_total.size * 2 + self.b_total.size * 4
        flops = 2 * n * din * dout
        bytes_accessed = 4 * n * (din + dout) + w_bytes
        cost = pl.CostEstimate(flops=int(flops),
                               transcendentals=int(n * dout),
                               bytes_accessed=int(bytes_accessed))

        # Footprint: double-buffered activation/output blocks + resident weights.
        footprint = 2 * bt * din * 4 + 2 * bt * dout * 4 + w_bytes
        vmem_limit = int(min(32 * 1024 * 1024, max(4 * 1024 * 1024, 2 * footprint)))

        return pl.pallas_call(
            _decoder_kernel,
            out_shape=jax.ShapeDtypeStruct((n, dout), dtype),
            grid=grid,
            in_specs=[
                pl.BlockSpec((bt, din), lambda i: (i, 0)),
                # Constant index_maps -> weights/bias DMA'd into VMEM once, revisited.
                pl.BlockSpec((din, dout), lambda i: (0, 0)),
                pl.BlockSpec((1, dout), lambda i: (0, 0)),
            ],
            out_specs=pl.BlockSpec((bt, dout), lambda i: (i, 0)),
            compiler_params=pltpu.CompilerParams(
                dimension_semantics=("parallel",),     # megacore split on v7x
                vmem_limit_bytes=vmem_limit,
            ),
            cost_estimate=cost,
        )

    # -- forward: NCHW in, NCHW out (torch semantics) --------------------------
    def forward(self, x_nchw):
        n = x_nchw.shape[0]
        din = int(np.prod(x_nchw.shape[1:]))
        assert din == self.d_in, "input shape mismatch"
        x_flat = x_nchw.reshape(n, din)               # contiguous, no transpose

        cache_key = (n, x_nchw.dtype)
        if cache_key not in self._fused_cache:
            self._fused_cache[cache_key] = self._build_fused(n, x_nchw.dtype)
        fused = self._fused_cache[cache_key]

        out_flat = fused(x_flat, self.M_total, self.b_total)   # single fused kernel

        c0 = self.channels[0]
        h = self.height
        return out_flat.reshape(n, c0, h, h)          # contiguous, no transpose


# ----------------------------------------------------------------------------
# Pure-JAX reference (independent f32 path via lax.conv_general_dilated)
# ----------------------------------------------------------------------------
def _reference_forward(dec, x_nchw):
    x = x_nchw
    for i, conv in enumerate(dec.conv_order):
        w, b = dec.params[i]                       # (Cin, Cout, k, k)
        k = dec.kernel[conv]
        s = dec.stride[conv]
        p = dec.padding[conv]
        out_h = dec.reversed_heights[i]
        op = out_h - ((x.shape[2] - 1) * s - 2 * p + k)
        wc = jnp.transpose(w, (1, 0, 2, 3))[:, :, ::-1, ::-1]   # (Cout, Cin, k, k) flipped
        x = jax.lax.conv_general_dilated(
            x, wc,
            window_strides=(1, 1),
            padding=[(k - 1 - p, k - 1 - p + op)] * 2,
            lhs_dilation=(s, s),
            dimension_numbers=("NCHW", "OIHW", "NCHW"),
        ) + b[None, :, None, None]
    return jnp.tanh(x)


if __name__ == "__main__":
    # Small config: height=16, 2 deconv layers, channels [1, 4, 8]
    height = 16
    kernel = [3, 3]
    channels = [1, 4, 8]
    stride = [2, 2]
    padding = [1, 1]

    key = jax.random.PRNGKey(0)
    key, pkey = jax.random.split(key)

    dec = CNNDecoderPallas(height, kernel, channels, stride, padding, pkey)
    bh = dec.bottleneck_height()                     # = 4

    # Two cases: tiny batch (single-step grid) and a batch large enough to get a
    # multi-step, megacore-parallel grid (n=144 -> bt=72, grid=(2,)).
    for n in (2, 144):
        key, xkey = jax.random.split(key)
        x = jax.random.normal(xkey, (n, channels[-1], bh, bh), jnp.float32)  # (n, 8, 4, 4)

        out = jax.block_until_ready(dec.forward(x))
        assert out.shape == (n, channels[0], height, height), out.shape

        ref = jax.block_until_ready(_reference_forward(dec, x))
        # Tolerance loosened vs the f32 kernel because M_total is stored/consumed
        # in bf16 (f32 MXU accumulation keeps the error ~1e-3).
        max_err = float(jnp.max(jnp.abs(out - ref)))
        assert jnp.allclose(out, ref, rtol=1e-2, atol=1e-2), (n, max_err)

    print("KERNEL_OK")
</pallas_src>

<mosaic_0001>
module attributes {stable_mosaic.version = 11 : i64} {
  func.func @_decoder_kernel(%arg0: i32, %arg1: memref<2x128xf32, #tpu.memory_space<vmem>>, %arg2: memref<128x256xbf16, #tpu.memory_space<vmem>>, %arg3: memref<1x256xf32, #tpu.memory_space<vmem>>, %arg4: memref<2x256xf32, #tpu.memory_space<vmem>>) attributes {dimension_semantics = [#tpu.dimension_semantics<parallel>], iteration_bounds = array<i64: 1>, scalar_prefetch = 0 : i64, scratch_operands = 0 : i64, tpu.core_type = #tpu.core_type<tc>, window_params = [{transform_indices = @transform_0, window_bounds = array<i64: 2, 128>}, {pipeline_mode = #tpu.pipeline_mode<synchronous>, transform_indices = @transform_1, window_bounds = array<i64: 128, 256>}, {pipeline_mode = #tpu.pipeline_mode<synchronous>, transform_indices = @transform_2, window_bounds = array<i64: 1, 256>}, {transform_indices = @transform_3, window_bounds = array<i64: 2, 256>}]} {
    %c0 = arith.constant 0 : index
    %c0_0 = arith.constant 0 : index
    %0 = vector.load %arg1[%c0, %c0_0] : memref<2x128xf32, #tpu.memory_space<vmem>>, vector<2x128xf32>
    %1 = arith.truncf %0 : vector<2x128xf32> to vector<2x128xbf16>
    %c0_1 = arith.constant 0 : index
    %c0_2 = arith.constant 0 : index
    %2 = vector.load %arg2[%c0_1, %c0_2] : memref<128x256xbf16, #tpu.memory_space<vmem>>, vector<128x256xbf16>
    %cst = arith.constant dense<0.000000e+00> : vector<2x256xf32>
    %3 = tpu.matmul %1, %2, %cst {dimension_numbers = #tpu.dot_dimension_numbers<[1], [0], [0], [1], [0, 0, 1, 1], [], []>} : vector<2x128xbf16>, vector<128x256xbf16>, vector<2x256xf32> -> vector<2x256xf32>
    %c0_3 = arith.constant 0 : index
    %c0_4 = arith.constant 0 : index
    %4 = vector.load %arg3[%c0_3, %c0_4] : memref<1x256xf32, #tpu.memory_space<vmem>>, vector<1x256xf32>
    %5 = vector.broadcast %4 : vector<1x256xf32> to vector<2x256xf32>
    %6 = arith.addf %3, %5 : vector<2x256xf32>
    %7 = math.tanh %6 : vector<2x256xf32>
    %c0_5 = arith.constant 0 : index
    %c0_6 = arith.constant 0 : index
    %8 = vector.load %arg4[%c0_5, %c0_6] : memref<2x256xf32, #tpu.memory_space<vmem>>, vector<2x256xf32>
    tpu.vector_store %arg4[%c0_5, %c0_6], %7 {strides = array<i32>} : memref<2x256xf32, #tpu.memory_space<vmem>>, vector<2x256xf32>,
    return
  }
  func.func @transform_0(%arg0: i32) -> (i32, i32) {
    %c0_i32 = arith.constant 0 : i32
    %c0_i32_0 = arith.constant 0 : i32
    return %arg0, %c0_i32 : i32, i32
  }
  func.func @transform_1(%arg0: i32) -> (i32, i32) {
    %c0_i32 = arith.constant 0 : i32
    %c0_i32_0 = arith.constant 0 : i32
    %c0_i32_1 = arith.constant 0 : i32
    return %c0_i32, %c0_i32_0 : i32, i32
  }
  func.func @transform_2(%arg0: i32) -> (i32, i32) {
    %c0_i32 = arith.constant 0 : i32
    %c0_i32_0 = arith.constant 0 : i32
    %c0_i32_1 = arith.constant 0 : i32
    return %c0_i32, %c0_i32_0 : i32, i32
  }
  func.func @transform_3(%arg0: i32) -> (i32, i32) {
    %c0_i32 = arith.constant 0 : i32
    %c0_i32_0 = arith.constant 0 : i32
    return %arg0, %c0_i32 : i32, i32
  }
}

</mosaic_0001>

<bundles_post_ra>
// kernel: tpu_custom_call.1
= control target key start
LH: loop header
LB: loop body
LE: loop exit
PB: predicated region body
PF: predicated region fallthrough
CT: control target
= control target key end

     0   :  { %8 = vsyncpa [#allocation3], 0  ;;  %s378_s0 = inlined_call_operand.hbm [shape: f32[2,128], index: 0, kind: input, shape index: {}]   ;;  %s379_s1 = inlined_call_operand.hbm [shape: bf16[128,256], index: 1, kind: input, shape index: {}]   ;;  %s380_s2 = inlined_call_operand.vmem [shape: f32[1,256], index: 2, kind: input, shape index: {}]   ;;  %s381_s3 = inlined_call_operand.hbm [shape: f32[2,256], index: 3, kind: output, shape index: {}]  }
   0x1   :  { %9 = vsyncpa [#allocation6], 0 }
   0x2   :  { %10 = vsyncpa [#allocation4], 0  ;;  %s340_s12 = smov [#allocation2]   ;;  %s341_s14 = smov [#allocation5]  }
   0x3   :  { %s17_s13 = sshll.u32 %s340_s12, 4  ;;  %s26_s15 = sshll.u32 %s341_s14, 4  ;;  %s18_s13 = int_to_ptr.vmem [resolvable:$true] %s17_s13  ;;  %s27_s15 = int_to_ptr.vmem [resolvable:$true] %s26_s15 }
   0x4   :  { %s282_s16 = scalar_lea.vmem %s18_s13, 32  ;;  %p287_p1 = scmp.lt.s32.totalorder %s18_s13, %s18_s13 }
   0x5   :  { %p283_p0 = scmp.ne.s32.totalorder %s18_s13, %s282_s16  ;;  %p288_p2 = scmp.lt.s32.totalorder %s282_s16, %s282_s16 }
   0x7   :  { %p289_p3 = por %p288_p2, %p287_p1 }
   0x9   :  { %p290_p4 = pnand %p289_p3, %p283_p0 }
   0xb   :  { %293 = shalt.err (!%p290_p4)
}
   0xc   :  { %20 = dma.hbm_to_vmem [thread:$0]  %s378_s0, 32, %s18_s13, [#allocation3]  }
   0xd   :  { %s302_s19 = scalar_lea.vmem %s27_s15, 2048  ;;  %p307_p6 = scmp.lt.s32.totalorder %s27_s15, %s27_s15 }
   0xe   :  { %p303_p5 = scmp.ne.s32.totalorder %s27_s15, %s302_s19  ;;  %p308_p7 = scmp.lt.s32.totalorder %s302_s19, %s302_s19 }
  0x10   :  { %p309_p8 = por %p308_p7, %p307_p6 }
  0x12   :  { %p310_p9 = pnand %p309_p8, %p303_p5 }
  0x14   :  { %313 = shalt.err (!%p310_p9)
}
  0x15   :  { %s342_s20 = smov 128   ;;  %s343_s21 = smov 8  }
  0x16   :  { %32 = dma.hbm_to_vmem [thread:$0]  %s379_s1, 2048, %s27_s15, [#allocation6], %s342_s20, %s342_s20, %s343_s21  }
  0x17   :  { %334 = dma.done.wait [#allocation3], 32  }
  0x18   :  { %335 = vsyncadd [#allocation3], 4294967264 }
  0x19   :  { %336 = dma.done.wait [#allocation6], 2048  }
  0x1a   :  { %337 = vsyncadd [#allocation6], 4294965248  ;;  %v344_v0 = vmov 0   ;;  %v246_v1 = vld [vmem:[#allocation5 + $0x74] ss:$8 sps:$4 sm:$0xff]   ;;  %v62_v19 = vlaneseq  ;;  %s345_s24 = smov [#allocation7]  }
  0x1b   :  { %184 = vmatprep.mubr.bf16.mxu0 %v344_v0  ;;  %v248_v2 = vld [vmem:[#allocation5 + $0x70] ss:$8 sps:$4 sm:$0xff]   ;;  %152 = vmatprep.subr.bf16.mxu0 %v246_v1  ;;  %v249_v3 = vld [vmem:[#allocation5 + $0x64] ss:$8 sps:$4 sm:$0xff]   ;;  %v251_v4 = vld [vmem:[#allocation5 + $0x60] ss:$8 sps:$4 sm:$0xff]  }
  0x1c   :  { %153 = vmatpush1.bf16.msra.mxu0 %v248_v2  ;;  %v252_v5 = vld [vmem:[#allocation5 + $0x54] ss:$8 sps:$4 sm:$0xff]   ;;  %v254_v6 = vld [vmem:[#allocation5 + $0x50] ss:$8 sps:$4 sm:$0xff]   ;;  %v255_v7 = vld [vmem:[#allocation5 + $0x44] ss:$8 sps:$4 sm:$0xff]  }
  0x1d   :  { %154 = vmatprep.subr.bf16.mxu0 %v249_v3  ;;  %v257_v8 = vld [vmem:[#allocation5 + $0x40] ss:$8 sps:$4 sm:$0xff]   ;;  %v258_v9 = vld [vmem:[#allocation5 + $0x34] ss:$8 sps:$4 sm:$0xff]   ;;  %v260_v10 = vld [vmem:[#allocation5 + $0x30] ss:$8 sps:$4 sm:$0xff]  }
  0x1e   :  { %v261_v11 = vld [vmem:[#allocation5 + $0x24] ss:$8 sps:$4 sm:$0xff]   ;;  %v263_v12 = vld [vmem:[#allocation5 + $0x20] ss:$8 sps:$4 sm:$0xff]   ;;  %v264_v13 = vld [vmem:[#allocation5 + $0x14] ss:$8 sps:$4 sm:$0xff]  }
  0x1f   :  { %v266_v14 = vld [vmem:[#allocation5 + $0x10] ss:$8 sps:$4 sm:$0xff]   ;;  %v267_v15 = vld [vmem:[#allocation5 + $0x4] ss:$8 sps:$4 sm:$0xff]   ;;  %v269_v16 = vld [vmem:[#allocation5] ss:$8 sps:$4 sm:$0xff]  }
  0x20   :  { %155 = vmatpush1.bf16.msra.mxu0 %v251_v4  ;;  %v42_v17 = vld [vmem:[#allocation2] sm:$0x3]  ;;  %v63_v20 = vshrl.u32 %v62_v19, 7  ;;  %s213_s25 = sshll.u32 %s345_s24, 4  ;;  %s214_s25 = int_to_ptr.vmem [resolvable:$true] %s213_s25 }
  0x21   :  { %156 = vmatprep.subr.bf16.mxu0 %v252_v5  ;;  %v43_v18 = vpack.c.bf16 %v42_v17, %v42_v17  ;;  %v60_v22 = vld [vmem:[%s380_s2] sm:$0x3]  ;;  %s314_s26 = scalar_lea.vmem %s214_s25, 64  ;;  %p319_p11 = scmp.lt.s32.totalorder %s214_s25, %s214_s25 }
  0x22   :  { %v64_v21 = vsub.s32 0, %v63_v20  ;;  %v68_v23 = vsub.s32 1, %v63_v20  ;;  %p315_p10 = scmp.ne.s32.totalorder %s214_s25, %s314_s26  ;;  %p320_p12 = scmp.lt.s32.totalorder %s314_s26, %s314_s26 }
  0x24   :  { %157 = vmatpush1.bf16.msra.mxu0 %v254_v6  ;;  %v65_v24 = vrot.slane %v60_v22, %v64_v21  ;;  %v69_v25 = vrot.slane %v60_v22, %v68_v23  ;;  %p321_p13 = por %p320_p12, %p319_p11 }
  0x25   :  { %158 = vmatprep.subr.bf16.mxu0 %v255_v7 }
  0x26   :  { %p322_p0 = pnand %p321_p13, %p315_p10 }
  0x28   :  { %159 = vmatpush1.bf16.msra.mxu0 %v257_v8 }
  0x29   :  { %160 = vmatprep.subr.bf16.mxu0 %v258_v9 }
  0x2c   :  { %161 = vmatpush1.bf16.msra.mxu0 %v260_v10 }
  0x2d   :  { %162 = vmatprep.subr.bf16.mxu0 %v261_v11 }
  0x30   :  { %163 = vmatpush1.bf16.msra.mxu0 %v263_v12 }
  0x31   :  { %164 = vmatprep.subr.bf16.mxu0 %v264_v13 }
  0x34   :  { %165 = vmatpush1.bf16.msra.mxu0 %v266_v14 }
  0x35   :  { %166 = vmatprep.subr.bf16.mxu0 %v267_v15 }
  0x38   :  { %167 = vmatpush1.bf16.msra.mxu0 %v269_v16 }
  0x3b   :  { %185 = vmatmul.mubr.bf16.vlgmr.msra.gmra.mxu0 %v43_v18 }
  0xfb   :  { %v186_v26 = vpop.f32.mrf.mxu0 }
  0xfc   :  { %v187_v27 = vadd.f32 %v186_v26, %v65_v24 }
  0xfd   :  { %v188_v28 = vpop.f32.mrf.mxu0 }
  0xfe   :  { %v189_v29 = vadd.f32 %v188_v28, %v69_v25  ;;  %270 = vtanh.f32 %v187_v27 }
  0xff   :  { %v190_v30 = vpop.f32.mrf.mxu0 }
 0x100   :  { %272 = vtanh.f32 %v189_v29 }
 0x101   :  { %v191_v31 = vpop.f32.mrf.mxu0 }
 0x10b   :  { %v271_v32 = vpop.eup %270 }
 0x10d   :  { %v273_v33 = vpop.eup %272 }
 0x10e   :  { %v197_v34 = vcombine.low %v271_v32, %v273_v33 }
 0x110   :  { %239 = vst.sshfl [vmem:[#allocation7] sm:$0x33 pattern:$0x76325410] %v197_v34 }
 0x111   :  { %325 = shalt.err (!%p322_p0)
}
 0x112   :  { %216 = dma.vmem_to_hbm [thread:$0]  %s214_s25, 64, %s381_s3, [#allocation4]  }
 0x113   :  { %338 = dma.done.wait [#allocation4], 64  }
 0x114   :  { %339 = vsyncadd [#allocation4], 4294967232 }
 0x115   :  { %220 = vsyncpa [#allocation3], 1 }
 0x116   :  { %221 = vsyncpa [#allocation6], 1 }
 0x117   :  { %222 = vsyncpa [#allocation4], 1 }

</bundles_post_ra>
